<compile_context>
chip_gen: v7x
topology: tpu7x:2x2x1
jax: 0.10.0
libtpu: 0.0.40
codegen_flags: <defaults>
</compile_context>

<pallas_src>
import jax
import jax.numpy as jnp
from jax.experimental import pallas as pl
from jax.experimental.pallas import tpu as pltpu


# ---------------------------------------------------------------------------
# Tunables
# ---------------------------------------------------------------------------
# Below this size, skip the Pallas call entirely (identity => return x).
_MIN_PALLAS_BYTES = 1 * 1024 * 1024
# Maximum number of outstanding HBM->HBM DMA descriptors.
_MAX_DMA_CHUNKS = 8
# Aim for at least this many bytes per DMA descriptor (long descriptors run
# at HBM roofline; more/shorter ones only add issue overhead).
_TARGET_CHUNK_BYTES = 2 * 1024 * 1024


# ---------------------------------------------------------------------------
# HBM -> HBM DMA copy kernel (no VMEM staging, no TensorCore compute)
# ---------------------------------------------------------------------------
def _make_hbm_copy_kernel(chunk_starts, chunk_sizes):
    """Kernel factory: one async HBM->HBM copy per static chunk along axis 0.

    All chunk copies are started back-to-back (each on its own DMA
    semaphore), then drained.  The DMA engines stream the data at HBM
    bandwidth while the TensorCore sits idle.
    """
    def kernel(x_hbm, o_hbm, sems):
        copies = []
        for i, (start, size) in enumerate(zip(chunk_starts, chunk_sizes)):
            cp = pltpu.make_async_copy(
                x_hbm.at[pl.ds(start, size)],
                o_hbm.at[pl.ds(start, size)],
                sems.at[i],
            )
            cp.start()
            copies.append(cp)
        for cp in copies:
            cp.wait()

    return kernel


def _pallas_hbm_copy(x: jax.Array) -> jax.Array:
    """Copy `x` to a fresh buffer via chunked HBM->HBM DMAs inside Pallas."""
    squeeze_back = False
    if x.ndim == 0:
        x = x.reshape(1)
        squeeze_back = True

    lead = x.shape[0]
    total_bytes = x.size * x.dtype.itemsize

    # Number of outstanding DMA chunks: bounded by the leading-axis extent,
    # by _MAX_DMA_CHUNKS, and by "each chunk should be >= ~2 MiB".
    want = max(1, total_bytes // _TARGET_CHUNK_BYTES)
    n_chunks = int(max(1, min(_MAX_DMA_CHUNKS, lead, want)))

    # Static chunk boundaries along axis 0 (first `rem` chunks get +1 row).
    base, rem = divmod(lead, n_chunks)
    starts, sizes = [], []
    offset = 0
    for i in range(n_chunks):
        sz = base + (1 if i < rem else 0)
        starts.append(offset)
        sizes.append(sz)
        offset += sz

    out = pl.pallas_call(
        _make_hbm_copy_kernel(tuple(starts), tuple(sizes)),
        out_shape=jax.ShapeDtypeStruct(x.shape, x.dtype),
        in_specs=[pl.BlockSpec(memory_space=pl.ANY)],
        out_specs=pl.BlockSpec(memory_space=pl.ANY),
        scratch_shapes=[pltpu.SemaphoreType.DMA((n_chunks,))],
    )(x)

    return out.reshape(()) if squeeze_back else out


def pallas_identity(x: jax.Array, *, force_pallas: bool = False) -> jax.Array:
    """Identity pass-through.

    Tiny tensors are returned as-is (no kernel launch).  Larger tensors are
    routed through the chunked HBM->HBM DMA copy kernel, which runs at pure
    DMA-engine / HBM roofline on every TPU generation.
    """
    if x.size == 0:
        return x
    nbytes = x.size * x.dtype.itemsize
    if not force_pallas and nbytes < _MIN_PALLAS_BYTES:
        # Cheapest correct identity: no kernel launch, no HBM round trip.
        return x
    return _pallas_hbm_copy(x)


# ---------------------------------------------------------------------------
# Module mirror
# ---------------------------------------------------------------------------
class BaseModelCustom:
    """JAX/Pallas mirror of the abstract PyTorch base class.

    Subclasses must override `forward` to define the data flow.  The base
    class itself defines no computation (matches the PyTorch semantics).
    """

    def forward(self, x: jax.Array) -> jax.Array:
        raise NotImplementedError(
            "You must implement the forward method in the derived class."
        )

    def __call__(self, x: jax.Array) -> jax.Array:
        return self.forward(x)


class _IdentityDemoModel(BaseModelCustom):
    """Minimal concrete subclass: forward == (size-gated) Pallas identity."""

    def __init__(self, force_pallas: bool = False):
        self._force_pallas = force_pallas

    def forward(self, x: jax.Array) -> jax.Array:
        return pallas_identity(x, force_pallas=self._force_pallas)


if __name__ == "__main__":
    key = jax.random.PRNGKey(0)
    k1, k2, k3 = jax.random.split(key, 3)

    # 1) Abstract-base contract: calling the base class must raise.
    base = BaseModelCustom()
    x_small = jax.random.normal(k1, (2, 4, 16, 16), dtype=jnp.float32)
    try:
        base(x_small)
        raise AssertionError("Base class forward should have raised.")
    except NotImplementedError:
        pass

    # 2) Tiny NCHW input (8 KiB), default gating: no kernel launch.
    model = _IdentityDemoModel()
    y_small = model(x_small)
    jax.block_until_ready(y_small)
    assert y_small.shape == x_small.shape and y_small.dtype == x_small.dtype
    assert bool(jnp.array_equal(y_small, x_small))

    # 3) Same tiny input, forced through the Pallas HBM->HBM DMA kernel
    #    (single chunk) to exercise the kernel path at the spec's shape.
    forced = _IdentityDemoModel(force_pallas=True)
    y_forced = forced(x_small)
    jax.block_until_ready(y_forced)
    assert y_forced.shape == x_small.shape and y_forced.dtype == x_small.dtype
    assert bool(jnp.array_equal(y_forced, x_small))

    # 4) Odd-shaped bf16 input forced through the kernel: the DMA path has no
    #    (8,128) / lane-alignment constraint and is dtype-agnostic.
    x_odd = jax.random.normal(k2, (3, 5, 7), dtype=jnp.float32).astype(jnp.bfloat16)
    y_odd = forced(x_odd)
    jax.block_until_ready(y_odd)
    assert y_odd.shape == x_odd.shape and y_odd.dtype == x_odd.dtype
    assert bool(jnp.array_equal(y_odd, x_odd))

    # 5) Larger NCHW input (8 MiB), default gating: goes through the kernel
    #    with 4 outstanding ~2 MiB HBM->HBM DMA chunks along axis 0.
    x_big = jax.random.normal(k3, (8, 8, 128, 256), dtype=jnp.float32)
    y_big = model(x_big)
    jax.block_until_ready(y_big)
    assert y_big.shape == x_big.shape and y_big.dtype == x_big.dtype
    assert bool(jnp.array_equal(y_big, x_big))

    print("KERNEL_OK")
</pallas_src>

<mosaic_0001>
module attributes {stable_mosaic.version = 11 : i64} {
  func.func @kernel(%arg0: memref<2x4x16x16xf32, #tpu.memory_space<any>>, %arg1: memref<2x4x16x16xf32, #tpu.memory_space<any>>, %arg2: memref<1x!tpu.dma_semaphore, #tpu.memory_space<semaphore_mem>>) attributes {dimension_semantics = [], scalar_prefetch = 0 : i64, scratch_operands = 1 : i64, tpu.core_type = #tpu.core_type<tc>} {
    %c0_i32 = arith.constant 0 : i32
    %c0_i32_0 = arith.constant 0 : i32
    %c0_i32_1 = arith.constant 0 : i32
    %c0_i32_2 = arith.constant 0 : i32
    %c0_i32_3 = arith.constant 0 : i32
    %0 = tpu.memref_slice %arg0[%c0_i32_0, %c0_i32_1, %c0_i32_2, %c0_i32_3] : memref<2x4x16x16xf32, #tpu.memory_space<any>> -> memref<2x4x16x16xf32, #tpu.memory_space<any>>
    %c0_i32_4 = arith.constant 0 : i32
    %c0_i32_5 = arith.constant 0 : i32
    %c0_i32_6 = arith.constant 0 : i32
    %c0_i32_7 = arith.constant 0 : i32
    %1 = tpu.memref_slice %arg1[%c0_i32_4, %c0_i32_5, %c0_i32_6, %c0_i32_7] : memref<2x4x16x16xf32, #tpu.memory_space<any>> -> memref<2x4x16x16xf32, #tpu.memory_space<any>>
    %2 = tpu.memref_slice %arg2[%c0_i32] : memref<1x!tpu.dma_semaphore, #tpu.memory_space<semaphore_mem>> -> memref<1x!tpu.dma_semaphore, #tpu.memory_space<semaphore_mem>>
    %3 = tpu.memref_squeeze %2 : memref<1x!tpu.dma_semaphore, #tpu.memory_space<semaphore_mem>> -> memref<!tpu.dma_semaphore, #tpu.memory_space<semaphore_mem>>
    tpu.enqueue_dma source(%0 : memref<2x4x16x16xf32, #tpu.memory_space<any>>) target(%1 : memref<2x4x16x16xf32, #tpu.memory_space<any>>) target_semaphore(%3 : memref<!tpu.dma_semaphore, #tpu.memory_space<semaphore_mem>>)
    %c0_i32_8 = arith.constant 0 : i32
    %c0_i32_9 = arith.constant 0 : i32
    %c0_i32_10 = arith.constant 0 : i32
    %c0_i32_11 = arith.constant 0 : i32
    %c0_i32_12 = arith.constant 0 : i32
    %4 = tpu.memref_slice %arg0[%c0_i32_9, %c0_i32_10, %c0_i32_11, %c0_i32_12] : memref<2x4x16x16xf32, #tpu.memory_space<any>> -> memref<2x4x16x16xf32, #tpu.memory_space<any>>
    %c0_i32_13 = arith.constant 0 : i32
    %c0_i32_14 = arith.constant 0 : i32
    %c0_i32_15 = arith.constant 0 : i32
    %c0_i32_16 = arith.constant 0 : i32
    %5 = tpu.memref_slice %arg1[%c0_i32_13, %c0_i32_14, %c0_i32_15, %c0_i32_16] : memref<2x4x16x16xf32, #tpu.memory_space<any>> -> memref<2x4x16x16xf32, #tpu.memory_space<any>>
    %6 = tpu.memref_slice %arg2[%c0_i32_8] : memref<1x!tpu.dma_semaphore, #tpu.memory_space<semaphore_mem>> -> memref<1x!tpu.dma_semaphore, #tpu.memory_space<semaphore_mem>>
    %7 = tpu.memref_squeeze %6 : memref<1x!tpu.dma_semaphore, #tpu.memory_space<semaphore_mem>> -> memref<!tpu.dma_semaphore, #tpu.memory_space<semaphore_mem>>
    tpu.wait_dma2 semaphore(%7 : memref<!tpu.dma_semaphore, #tpu.memory_space<semaphore_mem>>) src(%4 : memref<2x4x16x16xf32, #tpu.memory_space<any>>) dst(%5 : memref<2x4x16x16xf32, #tpu.memory_space<any>>)
    return
  }
}

</mosaic_0001>

<bundles_post_ra>
// kernel: tpu_custom_call.1
= control target key start
LH: loop header
LB: loop body
LE: loop exit
PB: predicated region body
PF: predicated region fallthrough
CT: control target
= control target key end

     0   :  { %s36_s6 = smov [#allocation2]   ;;  %s37_s7 = smov [#allocation3]   ;;  %s55_s0 = inlined_call_operand.hbm [shape: f32[2,4,16,16], index: 0, kind: input, shape index: {}]   ;;  %s56_s1 = inlined_call_operand.hbm [shape: f32[2,4,16,16], index: 1, kind: output, shape index: {}]  }
   0x1   :  { %s38_s8 = smov 0  }
   0x2   :  { %18 = dma.general %s55_s0, 2048, %s56_s1, %s36_s6, %s37_s7, [#allocation4], %s38_s8, 0  }
   0x3   :  { %34 = dma.done.wait [#allocation2], 2048 }
   0x4   :  { %35 = vsyncadd [#allocation2], 4294965248 }
   0x5   :  { %24 = vsyncmov [#allocation2] }
   0x8   :  { %s25_s13 = vpop.sfrf %24 }
   0x9   :  { %p30_p0 = scmp.ne.s32.totalorder %s25_s13, 0 }
   0xb   :  { %29 = shalt.err (%p30_p0)  }

</bundles_post_ra>
